<compile_context>
chip_gen: v7x
topology: tpu7x:2x2x1
jax: 0.10.0
libtpu: 0.0.40
codegen_flags: <defaults>
</compile_context>

<pallas_src>
import jax
import jax.numpy as jnp
from jax.experimental import pallas as pl
from jax.experimental.pallas import tpu as pltpu

_INV_SQRT2 = 0.7071067811865476
_SQRT_2_OVER_PI = 0.7978845608028654
_GELU_C = 0.044715


def _make_kernel(dm, Cx, TC, NC, TAIL, inv_T, approx_gelu):
    """Kernel over blocks x:(BB,Cx,TT), a/c:(Cx,dm), out:(1,BB,dm*Cx), acc scratch (BB,dm*Cx) f32."""

    def kernel(x_ref, a_ref, c_ref, o_ref, acc_ref):
        kt = pl.program_id(1)

        @pl.when(kt == 0)
        def _():
            acc_ref[...] = jnp.zeros_like(acc_ref)

        a = a_ref[...]              # (Cx, dm) — tiny; channel stays on sublanes
        c = c_ref[...]
        cdt = a.dtype               # compute dtype (f32, or bf16 if caller opted in)

        def accumulate(t_start, t_size):
            # Load one T-chunk; keeps live intermediates ~chunk-sized (no huge spills).
            xc = x_ref[:, :, pl.ds(t_start, t_size)].astype(cdt)   # (BB, Cx, t_size)
            for d in range(dm):                                     # static, dm is tiny
                ad = a[:, d:d + 1][None]                            # (1, Cx, 1) lane bcast
                cd = c[:, d:d + 1][None]
                y = ad * xc + cd                                    # folded BN + 1x1 dw conv
                if approx_gelu:
                    # tanh GELU: transcendental on the EUP slot, VALU stays light.
                    inner = y + jnp.asarray(_GELU_C, cdt) * (y * y * y)
                    t = jnp.tanh(jnp.asarray(_SQRT_2_OVER_PI, cdt) * inner)
                    g = jnp.asarray(0.5, cdt) * y * (jnp.asarray(1.0, cdt) + t)
                else:
                    yf = y.astype(jnp.float32)                      # exact PyTorch GELU
                    g = 0.5 * yf * (1.0 + jax.lax.erf(yf * _INV_SQRT2))
                s = jnp.sum(g.astype(jnp.float32), axis=-1)          # (BB, Cx) XLU reduce, f32
                acc_ref[:, d * Cx:(d + 1) * Cx] += s                 # d-major lane layout

        if NC > 0:
            @pl.loop(0, NC)                      # fori bounds live ranges per chunk
            def _(j):
                start = j * TC
                if TC % 128 == 0:
                    start = pl.multiple_of(start, 128)
                accumulate(start, TC)
        if TAIL > 0:
            accumulate(NC * TC, TAIL)            # static tail chunk

        @pl.when(kt == pl.num_programs(1) - 1)
        def _():
            o_ref[...] = (acc_ref[...] * inv_T)[None].astype(o_ref.dtype)

    return kernel


def _tpu_hw_info():
    """(physical VMEM bytes per core, is_v7x-class) — best-effort with safe fallbacks."""
    phys_vmem = 128 << 20
    is_v7 = False
    try:
        info = pltpu.get_tpu_info()
        v = getattr(info, "vmem_capacity_bytes", None)
        if v:
            phys_vmem = int(v)
    except Exception:
        pass
    try:
        kind = jax.devices()[0].device_kind.lower()
        if "v7" in kind:
            is_v7 = True
    except Exception:
        pass
    if phys_vmem <= (80 << 20):      # 64 MiB/TC ⇒ v7x-class budgets
        is_v7 = True
    phys_vmem = max(phys_vmem, 64 << 20)
    return phys_vmem, is_v7


def _largest_divisor_leq(n, limit):
    limit = max(1, min(n, int(limit)))
    for d in range(limit, 0, -1):
        if n % d == 0:
            return d
    return 1


def asymmetric_spatial_forward(x, params, left_indices, right_indices,
                               central_indices, depth_multiplier,
                               approximate_gelu=True, block_target_bytes=None):
    """x: (B, C, T). Returns fused features (B, (L+R+Cc)*dm) matching the PyTorch module.

    approximate_gelu=True  -> tanh GELU (EUP), matches GELU(approximate='tanh').
    approximate_gelu=False -> exact erf GELU (matches nn.GELU() default).
    """
    B, C, T = x.shape
    dm = int(depth_multiplier)

    branches = [("left", list(left_indices)), ("right", list(right_indices))]
    if central_indices:
        branches.append(("central", list(central_indices)))

    all_idx, a_rows, c_rows = [], [], []
    for name, idx in branches:
        p = params[name]
        n = len(idx)
        inv_std = 1.0 / jnp.sqrt(p["running_var"].astype(jnp.float32) + 1e-5)     # (n,)
        bn_scale = p["gamma"].astype(jnp.float32) * inv_std                       # (n,)
        bn_bias = (p["beta"].astype(jnp.float32)
                   - p["running_mean"].astype(jnp.float32) * bn_scale)            # (n,)
        w = p["conv_w"].reshape(n, dm).astype(jnp.float32)                        # dw 1x1 weights
        b = p["conv_b"].reshape(n, dm).astype(jnp.float32)
        a_rows.append(w * bn_scale[:, None])                                      # folded scale
        c_rows.append(w * bn_bias[:, None] + b)                                   # folded bias
        all_idx.extend(int(i) for i in idx)

    a_branch = jnp.concatenate(a_rows, axis=0)          # (n_total, dm)
    c_branch = jnp.concatenate(c_rows, axis=0)
    n_total = len(all_idx)
    idx_arr = jnp.asarray(all_idx, jnp.int32)

    unique = len(set(all_idx)) == n_total
    # Scatter fast path reads x untouched but wastes HBM+VALU on unused channels;
    # prefer a one-time gather when the selection is sparse.
    use_scatter = unique and (3 * n_total > 2 * C)
    if use_scatter:
        a_in = jnp.zeros((C, dm), jnp.float32).at[idx_arr].set(a_branch)
        c_in = jnp.zeros((C, dm), jnp.float32).at[idx_arr].set(c_branch)
        x_in, Cx = x, C
    else:
        a_in, c_in = a_branch, c_branch
        x_in, Cx = x[:, idx_arr, :], n_total

    # bf16 inputs: affine + GELU in bf16 (2x VALU packing on v6e/v7x); sums stay f32.
    compute_dtype = jnp.bfloat16 if x_in.dtype == jnp.bfloat16 else jnp.float32
    a_in = a_in.astype(compute_dtype)
    c_in = c_in.astype(compute_dtype)

    itemsize = x_in.dtype.itemsize
    out_itemsize = x.dtype.itemsize
    phys_vmem, is_v7 = _tpu_hw_info()
    if block_target_bytes is None:
        block_target_bytes = (4 << 20) if is_v7 else (8 << 20)
    chunk_budget = 1 << 20      # bytes of x per inner chunk (bounds in-kernel temporaries)

    # --- T tiling (grid axis 1, "arbitrary"; f32 accumulator lives in scratch) ---
    row_bytes = Cx * T * itemsize
    if row_bytes <= block_target_bytes:
        TT = T
    elif T % 128 == 0:
        cand = [t for t in range(128, T + 1, 128)
                if T % t == 0 and Cx * t * itemsize <= block_target_bytes]
        TT = max(cand) if cand else 128
    else:
        # TODO(synk): ragged T exceeding the VMEM budget would need a masked final
        # T-block; fall back to a single full-T block here.
        TT = T
    nt = T // TT

    # --- in-kernel chunking along the lane (T) axis within a block ---
    if TT % 128 == 0:
        TC = 128
        for candc in (512, 256):
            if TT % candc == 0:
                TC = candc
                break
        TC = min(TC, TT)
        NC, TAIL = TT // TC, 0
    else:
        TC, NC, TAIL = TT, 0, TT
    if NC == 1 and TAIL == 0:
        NC, TAIL = 0, TT            # single static chunk: skip the loop entirely

    # --- batch blocking (grid axis 0, "parallel") ---
    bb_limit = max(1, block_target_bytes // max(1, Cx * TT * itemsize))
    bb_limit = min(bb_limit, max(1, chunk_budget // max(1, Cx * max(TC, TAIL) * 4)))
    if is_v7 and B >= 2:
        bb_limit = min(bb_limit, max(1, B // 2))   # >=2 batch blocks so both TCs get work
    BB = _largest_divisor_leq(B, bb_limit)          # divisor of B: no jnp.pad copy of x
    nb = B // BB

    out_lanes = dm * Cx
    kernel = _make_kernel(dm, Cx, TC, NC, TAIL, 1.0 / float(T), bool(approximate_gelu))

    # Generation-aware VMEM limit: double-buffered x/out/param blocks + acc + chunk temps.
    x_block_bytes = BB * Cx * TT * itemsize
    needed = (2 * x_block_bytes
              + 2 * BB * out_lanes * out_itemsize
              + BB * out_lanes * 4
              + 4 * Cx * dm * 4
              + 8 * BB * Cx * max(TC, TAIL) * 4
              + (2 << 20))
    vmem_limit = int(min(max(needed, 32 << 20), phys_vmem - (8 << 20)))

    cost = pl.CostEstimate(
        flops=int(8 * B * Cx * T * dm),
        transcendentals=int(B * Cx * T * dm),
        bytes_accessed=int(B * Cx * T * itemsize + B * out_lanes * out_itemsize
                           + 2 * Cx * dm * 4),
    )

    out_blocks = pl.pallas_call(
        kernel,
        out_shape=jax.ShapeDtypeStruct((nb, BB, out_lanes), x.dtype),
        grid_spec=pltpu.PrefetchScalarGridSpec(
            num_scalar_prefetch=0,
            grid=(nb, nt),
            in_specs=[
                pl.BlockSpec((BB, Cx, TT), lambda i, k: (i, 0, k)),
                pl.BlockSpec((Cx, dm), lambda i, k: (0, 0)),
                pl.BlockSpec((Cx, dm), lambda i, k: (0, 0)),
            ],
            out_specs=pl.BlockSpec((1, BB, out_lanes), lambda i, k: (i, 0, 0)),
            scratch_shapes=[pltpu.VMEM((BB, out_lanes), jnp.float32)],
        ),
        compiler_params=pltpu.CompilerParams(
            dimension_semantics=("parallel", "arbitrary"),
            vmem_limit_bytes=vmem_limit),
        cost_estimate=cost,
    )(x_in, a_in, c_in)

    # Tiny post-processing on pooled features only (B * Cx * dm elements).
    out = out_blocks.reshape(B, dm, Cx)      # d-major lanes -> (B, dm, Cx)
    out = jnp.transpose(out, (0, 2, 1))      # (B, Cx, dm)
    if use_scatter:
        out = out[:, idx_arr, :]             # recover branch channel ordering
    return out.reshape(B, n_total * dm)


def init_params(key, branch_channel_counts, dm):
    """Deterministic synthetic parameters matching the module's shapes."""
    params = {}
    for name, n in branch_channel_counts.items():
        key, k1, k2, k3, k4, k5, k6 = jax.random.split(key, 7)
        params[name] = dict(
            gamma=jax.random.uniform(k1, (n,), jnp.float32, 0.5, 1.5),       # BN weight
            beta=jax.random.normal(k2, (n,), jnp.float32) * 0.1,             # BN bias
            running_mean=jax.random.normal(k3, (n,), jnp.float32) * 0.1,
            running_var=jax.random.uniform(k4, (n,), jnp.float32, 0.5, 1.5),
            conv_w=jax.random.normal(k5, (n * dm, 1, 1), jnp.float32),       # Conv1d weight (groups=n)
            conv_b=jax.random.normal(k6, (n * dm,), jnp.float32) * 0.1,      # Conv1d bias
        )
    return params


def reference_forward(x, params, left, right, central, dm, approximate_gelu=False):
    """Pure-JAX reference mirroring the PyTorch module (eval-mode BN)."""
    def branch(x_sel, p):
        inv_std = 1.0 / jnp.sqrt(p["running_var"] + 1e-5)
        x_bn = ((x_sel - p["running_mean"][None, :, None]) * inv_std[None, :, None]
                * p["gamma"][None, :, None] + p["beta"][None, :, None])
        w = p["conv_w"].reshape(-1)
        y = jnp.repeat(x_bn, dm, axis=1) * w[None, :, None] + p["conv_b"][None, :, None]
        g = jax.nn.gelu(y, approximate=bool(approximate_gelu))
        return jnp.mean(g, axis=-1)

    feats = [branch(x[:, jnp.asarray(left), :], params["left"]),
             branch(x[:, jnp.asarray(right), :], params["right"])]
    if central:
        feats.append(branch(x[:, jnp.asarray(central), :], params["central"]))
    return jnp.concatenate(feats, axis=1)


if __name__ == "__main__":
    B, C, T = 2, 16, 1024
    dm = 2
    left_indices = [0, 1, 2, 3, 4, 5]
    right_indices = [6, 7, 8, 9, 10, 11]
    central_indices = [12, 13, 14, 15]

    key = jax.random.PRNGKey(0)
    kx, kp = jax.random.split(key)
    x = jax.random.normal(kx, (B, C, T), jnp.float32)
    params = init_params(
        kp,
        {"left": len(left_indices), "right": len(right_indices),
         "central": len(central_indices)},
        dm,
    )
    n_out = (len(left_indices) + len(right_indices) + len(central_indices)) * dm

    # 1) Exact GELU (erf) path — must match PyTorch-exact reference tightly.
    exact = asymmetric_spatial_forward(x, params, left_indices, right_indices,
                                       central_indices, dm, approximate_gelu=False)
    exact = jax.block_until_ready(exact)
    ref_exact = reference_forward(x, params, left_indices, right_indices,
                                  central_indices, dm, approximate_gelu=False)
    assert exact.shape == (B, n_out)
    assert jnp.allclose(exact, ref_exact, atol=3e-5, rtol=3e-5), "exact-GELU mismatch"

    # 2) Default fast path: tanh GELU on the EUP (== GELU(approximate='tanh')).
    fast = asymmetric_spatial_forward(x, params, left_indices, right_indices,
                                      central_indices, dm)
    fast = jax.block_until_ready(fast)
    ref_tanh = reference_forward(x, params, left_indices, right_indices,
                                 central_indices, dm, approximate_gelu=True)
    assert fast.shape == (B, n_out)
    assert jnp.allclose(fast, ref_tanh, atol=2e-3, rtol=2e-3), "tanh-GELU mismatch"

    # 3) Force the T-grid accumulator path (tiny VMEM budget -> nt > 1 T-blocks).
    tiled = asymmetric_spatial_forward(x, params, left_indices, right_indices,
                                       central_indices, dm,
                                       block_target_bytes=32 << 10)
    tiled = jax.block_until_ready(tiled)
    assert jnp.allclose(tiled, ref_tanh, atol=2e-3, rtol=2e-3), "T-tiled path mismatch"

    print("KERNEL_OK")
</pallas_src>

<mosaic_0001>
module attributes {stable_mosaic.version = 11 : i64} {
  func.func @kernel(%arg0: i32, %arg1: i32, %arg2: memref<2x16x1024xf32, #tpu.memory_space<vmem>>, %arg3: memref<16x2xf32, #tpu.memory_space<vmem>>, %arg4: memref<16x2xf32, #tpu.memory_space<vmem>>, %arg5: memref<1x2x32xf32, #tpu.memory_space<vmem>>, %arg6: memref<2x32xf32, #tpu.memory_space<vmem>>) attributes {dimension_semantics = [#tpu.dimension_semantics<parallel>, #tpu.dimension_semantics<arbitrary>], iteration_bounds = array<i64: 1, 1>, scalar_prefetch = 0 : i64, scratch_operands = 1 : i64, tpu.core_type = #tpu.core_type<tc>, window_params = [{transform_indices = @transform_0, window_bounds = array<i64: 2, 16, 1024>}, {pipeline_mode = #tpu.pipeline_mode<synchronous>, transform_indices = @transform_1, window_bounds = array<i64: 16, 2>}, {pipeline_mode = #tpu.pipeline_mode<synchronous>, transform_indices = @transform_2, window_bounds = array<i64: 16, 2>}, {transform_indices = @transform_3, window_bounds = array<i64: 1, 2, 32>}]} {
    %c0_i32 = arith.constant 0 : i32
    %0 = arith.cmpi eq, %arg1, %c0_i32 : i32
    %1 = arith.extui %0 : i1 to i32
    %c0_i32_0 = arith.constant 0 : i32
    %2 = arith.cmpi ne, %1, %c0_i32_0 : i32
    scf.if %2 {
      %cst = arith.constant 0.000000e+00 : f32
      %9 = vector.broadcast %cst : f32 to vector<2x32xf32>
      %c0_8 = arith.constant 0 : index
      %c0_9 = arith.constant 0 : index
      %10 = vector.load %arg6[%c0_8, %c0_9] : memref<2x32xf32, #tpu.memory_space<vmem>>, vector<2x32xf32>
      tpu.vector_store %arg6[%c0_8, %c0_9], %9 {strides = array<i32>} : memref<2x32xf32, #tpu.memory_space<vmem>>, vector<2x32xf32>,
    } else {
    }
    %c0 = arith.constant 0 : index
    %c0_1 = arith.constant 0 : index
    %3 = vector.load %arg3[%c0, %c0_1] : memref<16x2xf32, #tpu.memory_space<vmem>>, vector<16x2xf32>
    %c0_2 = arith.constant 0 : index
    %c0_3 = arith.constant 0 : index
    %4 = vector.load %arg4[%c0_2, %c0_3] : memref<16x2xf32, #tpu.memory_space<vmem>>, vector<16x2xf32>
    %c0_i32_4 = arith.constant 0 : i32
    %c2_i32 = arith.constant 2 : i32
    %5 = arith.addi %c0_i32_4, %c2_i32 : i32
    %c1_i32 = arith.constant 1 : i32
    scf.for %arg7 = %c0_i32_4 to %5 step %c1_i32  : i32 {
      %c1_i32_8 = arith.constant 1 : i32
      %9 = arith.muli %arg7, %c1_i32_8 : i32
      %c0_i32_9 = arith.constant 0 : i32
      %10 = arith.addi %c0_i32_9, %9 : i32
      %c512_i32 = arith.constant 512 : i32
      %11 = arith.muli %10, %c512_i32 : i32
      %12 = tpu.assume_multiple %11, 128 : i32
      %c0_10 = arith.constant 0 : index
      %c0_11 = arith.constant 0 : index
      %13 = arith.index_cast %12 : i32 to index
      %14 = vector.load %arg2[%c0_10, %c0_11, %13] : memref<2x16x1024xf32, #tpu.memory_space<vmem>>, vector<2x16x512xf32>
      %15 = vector.extract_strided_slice %3 {offsets = [0, 0], sizes = [16, 1], strides = [1, 1]} : vector<16x2xf32> to vector<16x1xf32>
      %16 = vector.shape_cast %15 : vector<16x1xf32> to vector<1x16x1xf32>
      %17 = vector.extract_strided_slice %4 {offsets = [0, 0], sizes = [16, 1], strides = [1, 1]} : vector<16x2xf32> to vector<16x1xf32>
      %18 = vector.shape_cast %17 : vector<16x1xf32> to vector<1x16x1xf32>
      %19 = vector.broadcast %16 : vector<1x16x1xf32> to vector<2x16x512xf32>
      %20 = arith.mulf %19, %14 : vector<2x16x512xf32>
      %21 = vector.broadcast %18 : vector<1x16x1xf32> to vector<2x16x512xf32>
      %22 = arith.addf %20, %21 : vector<2x16x512xf32>
      %cst = arith.constant 5.000000e-01 : f32
      %23 = vector.broadcast %cst : f32 to vector<2x16x512xf32>
      %24 = arith.mulf %23, %22 : vector<2x16x512xf32>
      %cst_12 = arith.constant 0.707106769 : f32
      %25 = vector.broadcast %cst_12 : f32 to vector<2x16x512xf32>
      %26 = arith.mulf %22, %25 : vector<2x16x512xf32>
      %27 = math.erf %26 : vector<2x16x512xf32>
      %cst_13 = arith.constant 1.000000e+00 : f32
      %28 = vector.broadcast %cst_13 : f32 to vector<2x16x512xf32>
      %29 = arith.addf %28, %27 : vector<2x16x512xf32>
      %30 = arith.mulf %24, %29 : vector<2x16x512xf32>
      %cst_14 = arith.constant dense<0.000000e+00> : vector<2x16xf32>
      %31 = vector.multi_reduction <add>, %30, %cst_14 [2] : vector<2x16x512xf32> to vector<2x16xf32>
      %c0_15 = arith.constant 0 : index
      %c0_16 = arith.constant 0 : index
      %32 = vector.load %arg6[%c0_15, %c0_16] : memref<2x32xf32, #tpu.memory_space<vmem>>, vector<2x16xf32>
      %33 = arith.addf %32, %31 : vector<2x16xf32>
      %c0_17 = arith.constant 0 : index
      %c0_18 = arith.constant 0 : index
      %34 = vector.load %arg6[%c0_17, %c0_18] : memref<2x32xf32, #tpu.memory_space<vmem>>, vector<2x16xf32>
      tpu.vector_store %arg6[%c0_17, %c0_18], %33 {strides = array<i32>} : memref<2x32xf32, #tpu.memory_space<vmem>>, vector<2x16xf32>,
      %35 = vector.extract_strided_slice %3 {offsets = [0, 1], sizes = [16, 1], strides = [1, 1]} : vector<16x2xf32> to vector<16x1xf32>
      %36 = vector.shape_cast %35 : vector<16x1xf32> to vector<1x16x1xf32>
      %37 = vector.extract_strided_slice %4 {offsets = [0, 1], sizes = [16, 1], strides = [1, 1]} : vector<16x2xf32> to vector<16x1xf32>
      %38 = vector.shape_cast %37 : vector<16x1xf32> to vector<1x16x1xf32>
      %39 = vector.broadcast %36 : vector<1x16x1xf32> to vector<2x16x512xf32>
      %40 = arith.mulf %39, %14 : vector<2x16x512xf32>
      %41 = vector.broadcast %38 : vector<1x16x1xf32> to vector<2x16x512xf32>
      %42 = arith.addf %40, %41 : vector<2x16x512xf32>
      %cst_19 = arith.constant 5.000000e-01 : f32
      %43 = vector.broadcast %cst_19 : f32 to vector<2x16x512xf32>
      %44 = arith.mulf %43, %42 : vector<2x16x512xf32>
      %cst_20 = arith.constant 0.707106769 : f32
      %45 = vector.broadcast %cst_20 : f32 to vector<2x16x512xf32>
      %46 = arith.mulf %42, %45 : vector<2x16x512xf32>
      %47 = math.erf %46 : vector<2x16x512xf32>
      %cst_21 = arith.constant 1.000000e+00 : f32
      %48 = vector.broadcast %cst_21 : f32 to vector<2x16x512xf32>
      %49 = arith.addf %48, %47 : vector<2x16x512xf32>
      %50 = arith.mulf %44, %49 : vector<2x16x512xf32>
      %cst_22 = arith.constant dense<0.000000e+00> : vector<2x16xf32>
      %51 = vector.multi_reduction <add>, %50, %cst_22 [2] : vector<2x16x512xf32> to vector<2x16xf32>
      %c0_23 = arith.constant 0 : index
      %c16 = arith.constant 16 : index
      %52 = vector.load %arg6[%c0_23, %c16] : memref<2x32xf32, #tpu.memory_space<vmem>>, vector<2x16xf32>
      %53 = arith.addf %52, %51 : vector<2x16xf32>
      %c0_24 = arith.constant 0 : index
      %c16_25 = arith.constant 16 : index
      %54 = vector.load %arg6[%c0_24, %c16_25] : memref<2x32xf32, #tpu.memory_space<vmem>>, vector<2x16xf32>
      tpu.vector_store %arg6[%c0_24, %c16_25], %53 {strides = array<i32>} : memref<2x32xf32, #tpu.memory_space<vmem>>, vector<2x16xf32>,
    }
    %c2_i32_5 = arith.constant 2 : i32
    %c0_i32_6 = arith.constant 0 : i32
    %6 = arith.cmpi eq, %arg1, %c0_i32_6 : i32
    %7 = arith.extui %6 : i1 to i32
    %c0_i32_7 = arith.constant 0 : i32
    %8 = arith.cmpi ne, %7, %c0_i32_7 : i32
    scf.if %8 {
      %c0_8 = arith.constant 0 : index
      %c0_9 = arith.constant 0 : index
      %9 = vector.load %arg6[%c0_8, %c0_9] : memref<2x32xf32, #tpu.memory_space<vmem>>, vector<2x32xf32>
      %cst = arith.constant 9.765625E-4 : f32
      %10 = vector.broadcast %cst : f32 to vector<2x32xf32>
      %11 = arith.mulf %9, %10 : vector<2x32xf32>
      %12 = vector.shape_cast %11 : vector<2x32xf32> to vector<1x2x32xf32>
      %c0_10 = arith.constant 0 : index
      %c0_11 = arith.constant 0 : index
      %c0_12 = arith.constant 0 : index
      %13 = vector.load %arg5[%c0_10, %c0_11, %c0_12] : memref<1x2x32xf32, #tpu.memory_space<vmem>>, vector<1x2x32xf32>
      tpu.vector_store %arg5[%c0_10, %c0_11, %c0_12], %12 {strides = array<i32>} : memref<1x2x32xf32, #tpu.memory_space<vmem>>, vector<1x2x32xf32>,
    } else {
    }
    return
  }
  func.func @transform_0(%arg0: i32, %arg1: i32) -> (i32, i32, i32) {
    %c0_i32 = arith.constant 0 : i32
    %c0_i32_0 = arith.constant 0 : i32
    return %arg0, %c0_i32, %arg1 : i32, i32, i32
  }
  func.func @transform_1(%arg0: i32, %arg1: i32) -> (i32, i32) {
    %c0_i32 = arith.constant 0 : i32
    %c0_i32_0 = arith.constant 0 : i32
    %c0_i32_1 = arith.constant 0 : i32
    return %c0_i32, %c0_i32_0 : i32, i32
  }
  func.func @transform_2(%arg0: i32, %arg1: i32) -> (i32, i32) {
    %c0_i32 = arith.constant 0 : i32
    %c0_i32_0 = arith.constant 0 : i32
    %c0_i32_1 = arith.constant 0 : i32
    return %c0_i32, %c0_i32_0 : i32, i32
  }
  func.func @transform_3(%arg0: i32, %arg1: i32) -> (i32, i32, i32) {
    %c0_i32 = arith.constant 0 : i32
    %c0_i32_0 = arith.constant 0 : i32
    %c0_i32_1 = arith.constant 0 : i32
    return %arg0, %c0_i32, %c0_i32_0 : i32, i32, i32
  }
}

</mosaic_0001>

<bundles_post_ra>
// kernel: tpu_custom_call.1
= control target key start
LH: loop header
LB: loop body
LE: loop exit
PB: predicated region body
PF: predicated region fallthrough
CT: control target
= control target key end

     0   :  { %8 = vsyncpa [#allocation4], 0  ;;  %s876_s0 = inlined_call_operand.hbm [shape: f32[2,16,1024], index: 0, kind: input, shape index: {}]   ;;  %s877_s1 = inlined_call_operand.vmem [shape: f32[16,2], index: 1, kind: input, shape index: {}]   ;;  %s878_s2 = inlined_call_operand.vmem [shape: f32[16,2], index: 2, kind: input, shape index: {}]   ;;  %s879_s3 = inlined_call_operand.hbm [shape: f32[1,2,32], index: 3, kind: output, shape index: {}]  }
   0x1   :  { %9 = vsyncpa [#allocation5], 0  ;;  %s600_s12 = smov [#allocation3]   ;;  %s544_s16 = scalar_lea.hbm %s876_s0, 4096 }
   0x2   :  { %s15_s13 = sshll.u32 %s600_s12, 4  ;;  %p545_p0 = scmp.ne.s32.totalorder %s876_s0, %s544_s16  ;;  %s16_s13 = int_to_ptr.vmem [resolvable:$true] %s15_s13 }
   0x3   :  { %p548_p1 = scmp.lt.u32.totalorder %s544_s16, %s876_s0 }
   0x5   :  { %p550_p2 = pnand %p548_p1, %p545_p0 }
   0x7   :  { %553 = shalt.err (!%p550_p2)
}
   0x8   :  { %s554_s21 = scalar_lea.vmem %s16_s13, 4096  ;;  %p559_p4 = scmp.lt.s32.totalorder %s16_s13, %s16_s13 }
   0x9   :  { %p555_p3 = scmp.ne.s32.totalorder %s16_s13, %s554_s21  ;;  %p560_p5 = scmp.lt.s32.totalorder %s554_s21, %s554_s21 }
   0xb   :  { %p561_p6 = por %p560_p5, %p559_p4 }
   0xd   :  { %p562_p7 = pnand %p561_p6, %p555_p3 }
   0xf   :  { %565 = shalt.err (!%p562_p7)
}
  0x10   :  { %s601_s22 = smov 1024   ;;  %s602_s23 = smov 64  }
  0x11   :  { %21 = dma.hbm_to_vmem [thread:$0]  %s876_s0, 4096, %s16_s13, [#allocation4], %s601_s22, %s601_s22, %s602_s23  }
  0x12   :  { %592 = dma.done.wait [#allocation4], 4096  }
  0x13   :  { %593 = vsyncadd [#allocation4], 4294963200  ;;  %vm33_vm0 = vcmask 254976   ;;  %v603_v0 = vmov 0.0   ;;  %v643_v1 = vld [vmem:[%s877_s1] sm:$0xff]  ;;  %v648_v2 = vld [vmem:[%s877_s1 + $0x8] sm:$0xff] }
  0x14   :  { %34 = vst.msk [vmem:[#allocation2] sm:$0x3] %vm33_vm0, %v603_v0  ;;  %v653_v3 = vld [vmem:[%s878_s2] sm:$0xff]  ;;  %v658_v4 = vld [vmem:[%s878_s2 + $0x8] sm:$0xff]  ;;  %s660_s6 = smov 0  }
  0x15 LB: > { %v604_v5 = vmov 0   ;;  %v605_v6 = vmov 1   ;;  %s459_s1 = sshll.u32 %s598_s6, 9  ;;  %vm234_vm1 = vcmask 130112   ;;  %vm245_vm2 = vcmask 1041409   ;;  %s44_s6 = sadd.s32 1, %s598_s6   ;;  %s598_s6 = sphi %s660_s6, %s44_s6  }
  0x16   : > { %477 = vset.pattern.permute.xlu1 %v604_v5  ;;  %476 = vset.pattern.permute.xlu0 %v604_v5  ;;  %s46_s2 = sshra.s32 %s459_s1, 7  ;;  %vm249_vm3 = vcmask 123904   ;;  %vm414_vm4 = vcmask 261312   ;;  %vm428_vm5 = vcmask 255104   ;;  %p41_p8 = scmp.ge.s32.totalorder %s44_s6, 2  }
  0x17   : > { %94 = vperm.xlu1 %477, %v653_v3   ;;  %68 = vperm.xlu0 %476, %v643_v1   ;;  %s460_s7 = sshll.u32 %s46_s2, 3  ;;  %s606_s9 = smov (%p41_p8), [#allocation6]  }
  0x18   : > { %s674_s8 = scalar_lea.vmem [#allocation3], %s460_s7  ;;  %s443_s10 = sshll.u32 (%p41_p8), %s606_s9, 4  ;;  %s444_s10 = int_to_ptr.vmem [resolvable:$true] %s443_s10 }
  0x19   : > { %v677_v7 = vld [vmem:[%s674_s8] sm:$0xff]  ;;  %v680_v8 = vld [vmem:[%s674_s8 + $0x8] sm:$0xff]  ;;  %v683_v9 = vld [vmem:[%s674_s8 + $0x10] sm:$0xff]  ;;  %s566_s11 = scalar_lea.vmem (%p41_p8), %s444_s10, 32  ;;  %p571_p10 = scmp.lt.s32.totalorder (%p41_p8), %s444_s10, %s444_s10 }
  0x1a   : > { %v686_v10 = vld [vmem:[%s674_s8 + $0x18] sm:$0xff]  ;;  %v689_v11 = vld [vmem:[%s674_s8 + $0x80] sm:$0xff]  ;;  %v692_v12 = vld [vmem:[%s674_s8 + $0x88] sm:$0xff]  ;;  %p567_p9 = scmp.ne.s32.totalorder (%p41_p8), %s444_s10, %s566_s11  ;;  %p572_p11 = scmp.lt.s32.totalorder (%p41_p8), %s566_s11, %s566_s11 }
  0x1b   : > { %99 = vperm.xlu1 %477, %v658_v4   ;;  %73 = vperm.xlu0 %476, %v648_v2   ;;  %v695_v13 = vld [vmem:[%s674_s8 + $0x90] sm:$0xff]  ;;  %v702_v20 = vld [vmem:[%s674_s8 + $0x98] sm:$0xff]  ;;  %v708_v28 = vld [vmem:[%s674_s8 + $0x40] sm:$0xff] }
  0x1c   : > { %v711_v30 = vld [vmem:[%s674_s8 + $0x48] sm:$0xff]  ;;  %v714_v31 = vld [vmem:[%s674_s8 + $0x50] sm:$0xff]  ;;  %v717_v32 = vld [vmem:[%s674_s8 + $0x58] sm:$0xff]  ;;  %p573_p12 = por (%p41_p8), %p572_p11, %p571_p10 }
  0x1d   : > { %v720_v33 = vld [vmem:[%s674_s8 + $0xc0] sm:$0xff]  ;;  %v723_v34 = vld [vmem:[%s674_s8 + $0xc8] sm:$0xff]  ;;  %v731_v48 = vld [vmem:[%s674_s8 + $0xd0] sm:$0xff] }
  0x1e   : > { %v736_v56 = vld [vmem:[%s674_s8 + $0xd8] sm:$0xff]  ;;  %p574_p13 = pnand (%p41_p8), %p573_p12, %p567_p9 }
  0x1f   : > { %479 = vset.pattern.permute.xlu1 %v605_v6  ;;  %478 = vset.pattern.permute.xlu0 %v605_v6 }
  0x20   : > { %256 = vperm.xlu1 %479, %v648_v2   ;;  %252 = vperm.xlu0 %478, %v643_v1  }
  0x24   : > { %276 = vperm.xlu1 %479, %v653_v3   ;;  %280 = vperm.xlu0 %478, %v658_v4  }
  0x96   : > { %v69_v14 = vpop.permute.xlu0 %68  ;;  %v95_v15 = vpop.permute.xlu1 %94 }
  0x97   : > { %v76_v16 = vmul.f32 %v69_v14, %v677_v7  ;;  %v77_v17 = vmul.f32 %v69_v14, %v680_v8  ;;  %v78_v18 = vmul.f32 %v69_v14, %v683_v9  ;;  %v79_v19 = vmul.f32 %v69_v14, %v686_v10 }
  0x98   : > { %v84_v21 = vmul.f32 %v69_v14, %v689_v11  ;;  %v85_v22 = vmul.f32 %v69_v14, %v692_v12  ;;  %v86_v23 = vmul.f32 %v69_v14, %v695_v13  ;;  %v87_v35 = vmul.f32 %v69_v14, %v702_v20 }
  0x99   : > { %v102_v24 = vadd.f32 %v95_v15, %v76_v16  ;;  %v103_v25 = vadd.f32 %v95_v15, %v77_v17  ;;  %v104_v26 = vadd.f32 %v95_v15, %v78_v18  ;;  %v105_v27 = vadd.f32 %v95_v15, %v79_v19 }
  0x9a   : > { %v74_v29 = vpop.permute.xlu0 %73  ;;  %v110_v36 = vadd.f32 %v95_v15, %v84_v21  ;;  %v111_v37 = vadd.f32 %v95_v15, %v85_v22  ;;  %v112_v38 = vadd.f32 %v95_v15, %v86_v23  ;;  %v100_v43 = vpop.permute.xlu1 %99  ;;  %v739_v58 = vadd.f32 %v95_v15, %v87_v35 }
  0x9b   : > { %v134_v39 = vmul.f32 0.70710677, %v102_v24  ;;  %v135_v40 = vmul.f32 0.70710677, %v103_v25  ;;  %v136_v41 = vmul.f32 0.70710677, %v104_v26  ;;  %v80_v42 = vmul.f32 %v74_v29, %v708_v28 }
  0x9c   : > { %v137_v44 = vmul.f32 0.70710677, %v105_v27  ;;  %v81_v45 = vmul.f32 %v74_v29, %v711_v30  ;;  %v82_v46 = vmul.f32 %v74_v29, %v714_v31  ;;  %v83_v47 = vmul.f32 %v74_v29, %v717_v32 }
  0x9d   : > { %480 = verf.f32 %v134_v39  ;;  %v106_v49 = vadd.f32 %v100_v43, %v80_v42  ;;  %v88_v50 = vmul.f32 %v74_v29, %v720_v33  ;;  %v89_v51 = vmul.f32 %v74_v29, %v723_v34 }
  0x9e   : > { %482 = verf.f32 %v135_v40  ;;  %v107_v52 = vadd.f32 %v100_v43, %v81_v45  ;;  %v108_v53 = vadd.f32 %v100_v43, %v82_v46  ;;  %v109_v54 = vadd.f32 %v100_v43, %v83_v47 }
  0x9f   : > { %484 = verf.f32 %v136_v41  ;;  %v138_v55 = vmul.f32 0.70710677, %v106_v49  ;;  %v90_v57 = vmul.f32 %v74_v29, %v731_v48  ;;  %v118_v59 = vmul.f32 0.5, %v102_v24  ;;  %v744_v17 = vpop.permute.xlu0 %252  ;;  %v757_v41 = vpop.permute.xlu1 %256 }
  0xa0   : > { %v119_v60 = vmul.f32 0.5, %v103_v25  ;;  %v120_v61 = vmul.f32 0.5, %v104_v26  ;;  %486 = verf.f32 %v137_v44  ;;  %v139_v62 = vmul.f32 0.70710677, %v107_v52 }
  0xa1   : > { %v140_v63 = vmul.f32 0.70710677, %v108_v53  ;;  %v141_v0 = vmul.f32 0.70710677, %v109_v54  ;;  %488 = verf.f32 %v138_v55  ;;  %v91_v5 = vmul.f32 %v74_v29, %v736_v56 }
  0xa2   : > { %v114_v6 = vadd.f32 %v100_v43, %v88_v50  ;;  %v115_v14 = vadd.f32 %v100_v43, %v89_v51  ;;  %v742_v16 = vadd.f32 %v100_v43, %v90_v57  ;;  %v121_v18 = vmul.f32 0.5, %v105_v27 }
  0xa3   : > { %v122_v19 = vmul.f32 0.5, %v106_v49  ;;  %v123_v15 = vmul.f32 0.5, %v107_v52  ;;  %490 = verf.f32 %v139_v62  ;;  %v746_v21 = vmul.f32 0.5, %v108_v53  ;;  %v763_v51 = vpop.permute.xlu0 %280 }
  0xa4   : > { %v748_v22 = vmul.f32 0.5, %v109_v54  ;;  %492 = verf.f32 %v140_v63  ;;  %v117_v23 = vadd.f32 %v100_v43, %v91_v5  ;;  %v146_v24 = vmul.f32 0.70710677, %v114_v6 }
  0xa5   : > { %494 = verf.f32 %v141_v0  ;;  %v147_v25 = vmul.f32 0.70710677, %v115_v14  ;;  %v750_v26 = vmul.f32 0.5, %v110_v36  ;;  %v148_v29 = vmul.f32 0.70710677, %v742_v16 }
  0xa6   : > { %v149_v35 = vmul.f32 0.70710677, %v117_v23  ;;  %v753_v39 = vmul.f32 0.5, %v111_v37  ;;  %v755_v27 = vmul.f32 0.5, %v112_v38  ;;  %v759_v42 = vmul.f32 0.5, %v114_v6 }
  0xa7   : > { %v481_v40 = vpop.eup %480  ;;  %496 = verf.f32 %v146_v24  ;;  %v142_v44 = vmul.f32 0.70710677, %v110_v36  ;;  %v143_v43 = vmul.f32 0.70710677, %v111_v37  ;;  %v144_v47 = vmul.f32 0.70710677, %v112_v38 }
  0xa8   : > { %v483_v45 = vpop.eup %482  ;;  %v166_v46 = vadd.f32 1.0, %v481_v40  ;;  %498 = verf.f32 %v147_v25  ;;  %v263_v49 = vmul.f32 %v757_v41, %v708_v28  ;;  %v145_v53 = vmul.f32 0.70710677, %v739_v58 }
  0xa9   : > { %v485_v50 = vpop.eup %484  ;;  %v167_v52 = vadd.f32 1.0, %v483_v45  ;;  %500 = verf.f32 %v148_v29  ;;  %v264_v54 = vmul.f32 %v757_v41, %v711_v30  ;;  %v265_v38 = vmul.f32 %v757_v41, %v714_v31 }
  0xaa   : > { %v487_v55 = vpop.eup %486  ;;  %v168_v36 = vadd.f32 1.0, %v485_v50  ;;  %v182_v37 = vmul.f32 %v166_v46, %v118_v59  ;;  %502 = verf.f32 %v149_v35  ;;  %v266_v63 = vmul.f32 %v757_v41, %v717_v32 }
  0xab   : > { %v489_v57 = vpop.eup %488  ;;  %v169_v62 = vadd.f32 1.0, %v487_v55  ;;  %v183_v28 = vmul.f32 %v167_v52, %v119_v60  ;;  %504 = verf.f32 %v142_v44  ;;  %v131_v5 = vmul.f32 0.5, %v115_v14 }
  0xac   : > { %v170_v0 = vadd.f32 1.0, %v489_v57  ;;  %506 = verf.f32 %v143_v43  ;;  %v773_v6 = vadd.f32 %v763_v51, %v263_v49  ;;  %v184_v24 = vmul.f32 %v168_v36, %v120_v61 }
  0xad   : > { %v491_v30 = vpop.eup %490  ;;  %v198_v59 = vadd.f32 %v183_v28, %v182_v37  ;;  %508 = verf.f32 %v144_v47  ;;  %v776_v25 = vadd.f32 %v763_v51, %v264_v54  ;;  %v779_v35 = vadd.f32 %v763_v51, %v265_v38 }
  0xae   : > { %v493_v31 = vpop.eup %492  ;;  %v171_v29 = vadd.f32 1.0, %v491_v30  ;;  %v186_v60 = vmul.f32 %v170_v0, %v122_v19  ;;  %510 = verf.f32 %v145_v53  ;;  %v185_v14 = vmul.f32 %v169_v62, %v121_v18 }
  0xaf   : > { %v495_v32 = vpop.eup %494  ;;  %v199_v40 = vadd.f32 %v198_v59, %v184_v24  ;;  %v172_v44 = vadd.f32 1.0, %v493_v31  ;;  %v782_v43 = vadd.f32 %v763_v51, %v266_v63  ;;  %v132_v46 = vmul.f32 0.5, %v742_v16  ;;  %v794_v63 = vpop.permute.xlu1 %276 }
  0xb0   : > { %v173_v61 = vadd.f32 1.0, %v495_v32  ;;  %v187_v45 = vmul.f32 %v171_v29, %v123_v15  ;;  %v133_v47 = vmul.f32 0.5, %v117_v23  ;;  %v319_v52 = vmul.f32 0.70710677, %v773_v6 }
  0xb1   : > { %v497_v49 = vpop.eup %496  ;;  %v200_v50 = vadd.f32 %v199_v40, %v185_v14  ;;  %v188_v19 = vmul.f32 %v172_v44, %v746_v21  ;;  %v320_v53 = vmul.f32 0.70710677, %v776_v25  ;;  %v321_v37 = vmul.f32 0.70710677, %v779_v35 }
  0xb2   : > { %v499_v54 = vpop.eup %498  ;;  %v189_v18 = vmul.f32 %v173_v61, %v748_v22  ;;  %v203_v55 = vadd.f32 %v187_v45, %v186_v60  ;;  %v178_v36 = vadd.f32 1.0, %v497_v49  ;;  %v322_v16 = vmul.f32 0.70710677, %v782_v43 }
  0xb3   : > { %v501_v38 = vpop.eup %500  ;;  %201 = vadd.xlane.f32.xlu1 %v200_v50  ;;  %v179_v15 = vadd.f32 1.0, %v499_v54  ;;  %512 = verf.f32 %v319_v52  ;;  %v259_v21 = vmul.f32 %v744_v17, %v677_v7  ;;  %v260_v24 = vmul.f32 %v744_v17, %v680_v8 }
  0xb4   : > { %v503_v23 = vpop.eup %502  ;;  %v204_v57 = vadd.f32 %v203_v55, %v188_v19  ;;  %v180_v62 = vadd.f32 1.0, %v501_v38  ;;  %v194_v28 = vmul.f32 %v178_v36, %v759_v42  ;;  %514 = verf.f32 %v320_v53 }
  0xb5   : > { %v505_v22 = vpop.eup %504  ;;  %v181_v0 = vadd.f32 1.0, %v503_v23  ;;  %v195_v30 = vmul.f32 %v179_v15, %v131_v5  ;;  %516 = verf.f32 %v321_v37  ;;  %v261_v42 = vmul.f32 %v744_v17, %v683_v9 }
  0xb6   : > { %v507_v59 = vpop.eup %506  ;;  %v205_v31 = vadd.f32 %v204_v57, %v189_v18  ;;  %v196_v29 = vmul.f32 %v180_v62, %v132_v46  ;;  %v174_v60 = vadd.f32 1.0, %v505_v22  ;;  %518 = verf.f32 %v322_v16 }
  0xb7   : > { %v509_v7 = vpop.eup %508  ;;  %v197_v32 = vmul.f32 %v181_v0, %v133_v47  ;;  %v213_v14 = vadd.f32 %v195_v30, %v194_v28  ;;  %v175_v40 = vadd.f32 1.0, %v507_v59  ;;  %v262_v8 = vmul.f32 %v744_v17, %v686_v10 }
  0xb8   : > { %v511_v44 = vpop.eup %510  ;;  %206 = vadd.xlane.f32.xlu0 %v205_v31  ;;  %v176_v61 = vadd.f32 1.0, %v509_v7  ;;  %v190_v5 = vmul.f32 %v174_v60, %v750_v26  ;;  %v804_v45 = vadd.f32 %v794_v63, %v259_v21  ;;  %v808_v50 = vadd.f32 %v794_v63, %v260_v24 }
  0xb9   : > { %v214_v46 = vadd.f32 %v213_v14, %v196_v29  ;;  %v177_v49 = vadd.f32 1.0, %v511_v44  ;;  %v191_v47 = vmul.f32 %v175_v40, %v753_v39  ;;  %v129_v9 = vmul.f32 0.5, %v739_v58 }
  0xba   : > { %v303_v19 = vmul.f32 0.5, %v773_v6  ;;  %v813_v52 = vadd.f32 %v794_v63, %v261_v42  ;;  %v816_v26 = vadd.f32 %v794_v63, %v262_v8  ;;  %v192_v53 = vmul.f32 %v176_v61, %v755_v27 }
  0xbb   : > { %v215_v10 = vadd.f32 %v214_v46, %v197_v32  ;;  %v208_v54 = vadd.f32 %v191_v47, %v190_v5  ;;  %v304_v18 = vmul.f32 0.5, %v776_v25  ;;  %v193_v39 = vmul.f32 %v177_v49, %v129_v9 }
  0xbc   : > { %v305_v55 = vmul.f32 0.5, %v779_v35  ;;  %v315_v36 = vmul.f32 0.70710677, %v804_v45  ;;  %v316_v58 = vmul.f32 0.70710677, %v808_v50  ;;  %v271_v27 = vmul.f32 %v757_v41, %v720_v33 }
  0xbd   : > { %v513_v6 = vpop.eup %512  ;;  %216 = vadd.xlane.f32.xlu1 %v215_v10  ;;  %v209_v37 = vadd.f32 %v208_v54, %v192_v53  ;;  %v317_v38 = vmul.f32 0.70710677, %v813_v52  ;;  %v318_v15 = vmul.f32 0.70710677, %v816_v26  ;;  %v272_v25 = vmul.f32 %v757_v41, %v723_v34 }
  0xbe   : > { %v515_v16 = vpop.eup %514  ;;  %v351_v21 = vadd.f32 1.0, %v513_v6  ;;  %520 = verf.f32 %v315_v36  ;;  %v273_v35 = vmul.f32 %v757_v41, %v731_v48  ;;  %v274_v28 = vmul.f32 %v757_v41, %v736_v56 }
  0xbf   : > { %v517_v23 = vpop.eup %516  ;;  %v210_v57 = vadd.f32 %v209_v37, %v193_v39  ;;  %v352_v62 = vadd.f32 1.0, %v515_v16  ;;  %522 = verf.f32 %v316_v58  ;;  %v295_v33 = vadd.f32 %v763_v51, %v271_v27 }
  0xc0   : > { %v519_v22 = vpop.eup %518  ;;  %v353_v0 = vadd.f32 1.0, %v517_v23  ;;  %v367_v30 = vmul.f32 %v351_v21, %v303_v19  ;;  %524 = verf.f32 %v317_v38  ;;  %v296_v34 = vadd.f32 %v763_v51, %v272_v25 }
  0xc1   : > { %211 = vadd.xlane.f32.xlu0 %v210_v57  ;;  %v354_v24 = vadd.f32 1.0, %v519_v22  ;;  %v368_v59 = vmul.f32 %v352_v62, %v304_v18  ;;  %526 = verf.f32 %v318_v15  ;;  %v306_v48 = vmul.f32 0.5, %v782_v43 }
  0xc2   : > { %v297_v31 = vadd.f32 %v763_v51, %v273_v35  ;;  %v838_v29 = vadd.f32 %v763_v51, %v274_v28  ;;  %v369_v56 = vmul.f32 %v353_v0, %v305_v55  ;;  %v327_v60 = vmul.f32 0.70710677, %v295_v33 }
  0xc3   : > { %v384_v41 = vadd.f32 %v368_v59, %v367_v30  ;;  %v370_v7 = vmul.f32 %v354_v24, %v306_v48  ;;  %v328_v32 = vmul.f32 0.70710677, %v296_v34  ;;  %v267_v44 = vmul.f32 %v744_v17, %v689_v11 }
  0xc4   : > { %v329_v14 = vmul.f32 0.70710677, %v297_v31  ;;  %v330_v42 = vmul.f32 0.70710677, %v838_v29  ;;  %528 = verf.f32 %v327_v60  ;;  %v268_v43 = vmul.f32 %v744_v17, %v692_v12 }
  0xc5   : > { %v385_v40 = vadd.f32 %v384_v41, %v369_v56  ;;  %530 = verf.f32 %v328_v32  ;;  %v269_v51 = vmul.f32 %v744_v17, %v695_v13  ;;  %v270_v61 = vmul.f32 %v744_v17, %v702_v20 }
  0xc6   : > { %532 = verf.f32 %v329_v14  ;;  %v291_v8 = vadd.f32 %v794_v63, %v267_v44  ;;  %v292_v49 = vadd.f32 %v794_v63, %v268_v43  ;;  %v299_v12 = vmul.f32 0.5, %v804_v45 }
  0xc7   : > { %v386_v5 = vadd.f32 %v385_v40, %v370_v7  ;;  %534 = verf.f32 %v330_v42  ;;  %v293_v11 = vadd.f32 %v794_v63, %v269_v51  ;;  %v294_v47 = vadd.f32 %v794_v63, %v270_v61 }
  0xc8   : > { %v521_v46 = vpop.eup %520  ;;  %v323_v19 = vmul.f32 0.70710677, %v291_v8  ;;  %v300_v20 = vmul.f32 0.5, %v808_v50  ;;  %v301_v17 = vmul.f32 0.5, %v813_v52  ;;  %v324_v55 = vmul.f32 0.70710677, %v292_v49 }
  0xc9   : > { %v523_v9 = vpop.eup %522  ;;  %387 = vadd.xlane.f32.xlu1 %v386_v5  ;;  %v347_v13 = vadd.f32 1.0, %v521_v46  ;;  %v325_v36 = vmul.f32 0.70710677, %v293_v11  ;;  %v326_v63 = vmul.f32 0.70710677, %v294_v47  ;;  %v302_v45 = vmul.f32 0.5, %v816_v26 }
  0xca   : > { %v525_v10 = vpop.eup %524  ;;  %v348_v53 = vadd.f32 1.0, %v523_v9  ;;  %536 = verf.f32 %v323_v19  ;;  %v311_v16 = vmul.f32 0.5, %v295_v33  ;;  %v312_v35 = vmul.f32 0.5, %v296_v34 }
  0xcb   : > { %v527_v54 = vpop.eup %526  ;;  %v349_v18 = vadd.f32 1.0, %v525_v10  ;;  %v363_v39 = vmul.f32 %v347_v13, %v299_v12  ;;  %538 = verf.f32 %v324_v55  ;;  %v313_v0 = vmul.f32 0.5, %v297_v31 }
  0xcc   : > { %v350_v58 = vadd.f32 1.0, %v527_v54  ;;  %v364_v6 = vmul.f32 %v348_v53, %v300_v20  ;;  %540 = verf.f32 %v325_v36  ;;  %v314_v24 = vmul.f32 0.5, %v838_v29 }
  0xcd   : > { %v365_v37 = vmul.f32 %v349_v18, %v301_v17  ;;  %542 = verf.f32 %v326_v63  ;;  %v307_v7 = vmul.f32 0.5, %v291_v8  ;;  %v308_v14 = vmul.f32 0.5, %v292_v49 }
  0xce   : > { %v379_v38 = vadd.f32 %v364_v6, %v363_v39  ;;  %v529_v15 = vpop.eup %528  ;;  %v366_v52 = vmul.f32 %v350_v58, %v302_v45  ;;  %v309_v51 = vmul.f32 0.5, %v293_v11  ;;  %v310_v29 = vmul.f32 0.5, %v294_v47  ;;  %v218_v6 = vld [vmem:[#allocation2] sm:$0x3] }
  0xcf   : > { %v531_v50 = vpop.eup %530  ;;  %v359_v21 = vadd.f32 1.0, %v529_v15  ;;  %v223_v8 = vlaneseq }
  0xd0   : > { %v380_v27 = vadd.f32 %v379_v38, %v365_v37  ;;  %v533_v25 = vpop.eup %532  ;;  %v360_v23 = vadd.f32 1.0, %v531_v50 }
  0xd1   : > { %v535_v57 = vpop.eup %534  ;;  %v361_v28 = vadd.f32 1.0, %v533_v25  ;;  %v375_v22 = vmul.f32 %v359_v21, %v311_v16  ;;  %v224_v10 = vand.u32 127, %v223_v8  ;;  %v226_v17 = vshrl.u32 %v223_v8, 7 }
  0xd2   : > { %v381_v62 = vadd.f32 %v380_v27, %v366_v52  ;;  %v362_v30 = vadd.f32 1.0, %v535_v57  ;;  %v376_v26 = vmul.f32 %v360_v23, %v312_v35 }
  0xd3   : > { %v377_v59 = vmul.f32 %v361_v28, %v313_v0  ;;  %v229_v20 = vadd.s32 4294967288, %v224_v10  ;;  %v227_v18 = vsub.s32 %v224_v10, %v226_v17  ;;  %v409_v50 = vadd.s32 4294967272, %v224_v10 }
  0xd4   : > { %382 = vadd.xlane.f32.xlu0 %v381_v62  ;;  %v394_v48 = vadd.f32 %v376_v26, %v375_v22  ;;  %v537_v56 = vpop.eup %536  ;;  %v378_v60 = vmul.f32 %v362_v30, %v314_v24  ;;  %v404_v52 = vadd.s32 4294967280, %v224_v10 }
  0xd5   : > { %v539_v41 = vpop.eup %538  ;;  %v355_v32 = vadd.f32 1.0, %v537_v56  ;;  %v232_v54 = vsub.s32 %v229_v20, %v226_v17  ;;  %v412_v16 = vsub.s32 %v409_v50, %v226_v17 }
  0xd6   : > { %v395_v33 = vadd.f32 %v394_v48, %v377_v59  ;;  %v541_v34 = vpop.eup %540  ;;  %v356_v40 = vadd.f32 1.0, %v539_v41  ;;  %v407_v21 = vsub.s32 %v404_v52, %v226_v17 }
  0xd7   : > { %v543_v42 = vpop.eup %542  ;;  %v357_v43 = vadd.f32 1.0, %v541_v34  ;;  %v371_v31 = vmul.f32 %v355_v32, %v307_v7 }
  0xd8   : > { %v396_v44 = vadd.f32 %v395_v33, %v378_v60  ;;  %v358_v61 = vadd.f32 1.0, %v543_v42  ;;  %v372_v5 = vmul.f32 %v356_v40, %v308_v14 }
  0xd9   : > { %v373_v46 = vmul.f32 %v357_v43, %v309_v51 }
  0xda   : > { %397 = vadd.xlane.f32.xlu1 %v396_v44  ;;  %v389_v9 = vadd.f32 %v372_v5, %v371_v31  ;;  %v374_v12 = vmul.f32 %v358_v61, %v310_v29 }
  0xdc   : > { %v390_v13 = vadd.f32 %v389_v9, %v373_v46 }
  0xde   : > { %v391_v19 = vadd.f32 %v390_v13, %v374_v12 }
  0xe0   : > { %392 = vadd.xlane.f32.xlu0 %v391_v19 }
 0x140   : > { %v202_v49 = vpop.xlane.xlu1 %201 }
 0x141   : > { %v228_v36 = vrot.slane %v202_v49, %v227_v18 }
 0x145   : > { %v207_v53 = vpop.xlane.xlu0 %206 }
 0x146   : > { %v233_v11 = vrot.slane %v207_v53, %v232_v54 }
 0x148   : > { %v235_v63 = vsel %vm234_vm1, %v233_v11, %v228_v36 }
 0x14a   : > { %v217_v39 = vpop.xlane.xlu1 %216 }
 0x14b   : > { %v243_v47 = vrot.slane %v217_v39, %v232_v54 }
 0x14e   : > { %v212_v55 = vpop.xlane.xlu0 %211 }
 0x14f   : > { %v239_v58 = vrot.slane %v212_v55, %v227_v18 }
 0x151   : > { %v244_v45 = vsel %vm234_vm1, %v243_v47, %v239_v58 }
 0x152   : > { %v246_v37 = vsel %vm245_vm2, %v244_v45, %v235_v63 }
 0x153   : > { %v248_v38 = vadd.f32 %v246_v37, %v218_v6 }
 0x155   : > { %250 = vst.msk [vmem:[#allocation2] sm:$0x3] %vm249_vm3, %v248_v38 }
 0x156   : > { %v388_v15 = vpop.xlane.xlu1 %387 }
 0x157   : > { %v413_v35 = vrot.slane %v388_v15, %v412_v16 }
 0x15c   : > { %v399_v22 = vld [vmem:[#allocation2] sm:$0x3] }
 0x161   : > { %v383_v27 = vpop.xlane.xlu0 %382 }
 0x162   : > { %v408_v23 = vrot.slane %v383_v27, %v407_v21 }
 0x164   : > { %v415_v0 = vsel %vm414_vm4, %v413_v35, %v408_v23 }
 0x167   : > { %v398_v25 = vpop.xlane.xlu1 %397 }
 0x168   : > { %v423_v57 = vrot.slane %v398_v25, %v412_v16 }
 0x16d   : > { %v393_v62 = vpop.xlane.xlu0 %392 }
 0x16e   : > { %v419_v28 = vrot.slane %v393_v62, %v407_v21  ;;  %43 = sbr.rel (!%p41_p8) target bundleno = 21 (0x15), region = 52 }
 0x170   : > { %v424_v30 = vsel %vm414_vm4, %v423_v57, %v419_v28 }
 0x171   : > { %v425_v26 = vsel %vm245_vm2, %v424_v30, %v415_v0 }
 0x172   : > { %v427_v24 = vadd.f32 %v425_v26, %v399_v22 }
 0x174   : > { %429 = vst.msk [vmem:[#allocation2] sm:$0x3] %vm428_vm5, %v427_v24 }
 0x17b   :  { %v433_v59 = vld [vmem:[#allocation2] sm:$0x3] }
 0x17c   :  { %v434_v48 = vmul.f32 0.0009765625, %v433_v59 }
 0x17e   :  { %436 = vst.msk [vmem:[#allocation6] sm:$0x3] %vm33_vm0, %v434_v48 }
 0x17f   :  { %577 = shalt.err (!%p574_p13)
}
 0x180   :  { %s578_s14 = scalar_lea.hbm %s879_s3, 32 }
 0x181   :  { %p579_p0 = scmp.ne.s32.totalorder %s879_s3, %s578_s14  ;;  %p582_p1 = scmp.lt.u32.totalorder %s578_s14, %s879_s3 }
 0x183   :  { %p584_p2 = pnand %p582_p1, %p579_p0 }
 0x185   :  { %587 = shalt.err (!%p584_p2)
}
 0x186   :  { %446 = dma.vmem_to_hbm [thread:$0]  %s444_s10, 32, %s879_s3, [#allocation5]  }
 0x187   :  { %594 = dma.done.wait [#allocation5], 32  }
 0x188   :  { %595 = vsyncadd [#allocation5], 4294967264 }
 0x189   :  { %450 = vsyncpa [#allocation4], 1 }
 0x18a   :  { %451 = vsyncpa [#allocation5], 1 }

</bundles_post_ra>
